<compile_context>
chip_gen: v7x
topology: tpu7x:2x2x1
jax: 0.10.0
libtpu: 0.0.40
codegen_flags: <defaults>
</compile_context>

<pallas_src>
import functools

import jax
import jax.numpy as jnp
import numpy as np
from jax import lax
from jax.experimental import pallas as pl
from jax.experimental.pallas import tpu as pltpu


def _qkv_proj_kernel(x_ref, w_ref, b_ref, q_ref, k_ref, v_ref, *,
                     head_dim, scale, mxu_dtype):
    """One grid step = (batch b, head h): QKV projection for this head.

    Done once per (b, h) — not per q tile — as one (Np, C) @ (C, 3*hd) GEMM.
    """
    x = x_ref[0].astype(mxu_dtype)                         # (Np, C)
    w = w_ref[0]                                           # (C, 3*hd), mxu_dtype
    qkv = jnp.dot(x, w, preferred_element_type=jnp.float32)  # (Np, 3*hd) f32
    qkv = qkv + b_ref[0]                                   # + (1, 3*hd) bias (f32)
    # Fold the softmax scale into q here (once), not on every score tile.
    q_ref[0, 0] = (qkv[:, 0:head_dim] * scale).astype(q_ref.dtype)
    k_ref[0, 0] = qkv[:, head_dim:2 * head_dim].astype(k_ref.dtype)
    v_ref[0, 0] = qkv[:, 2 * head_dim:3 * head_dim].astype(v_ref.dtype)


def _attention_kernel(q_ref, k_ref, v_ref, wproj_ref, bproj_ref,
                      y_ref, attn_ref, y_acc_ref, *,
                      heads, n_pad, n_valid, mxu_dtype):
    """One grid step = (batch b, q-row tile qi, head h); heads is innermost."""
    h = pl.program_id(2)

    q = q_ref[0, 0]                                        # (tq, hd), pre-scaled
    k = k_ref[0, 0]                                        # (Np, hd)
    v = v_ref[0, 0]                                        # (Np, hd)

    # Contract trailing (hd) dims directly -> MXU consumes k untransposed.
    s = lax.dot_general(q, k, (((1,), (1,)), ((), ())),
                        preferred_element_type=jnp.float32)  # (tq, Np) f32
    if n_valid < n_pad:                                    # static: mask padded keys
        col = lax.broadcasted_iota(jnp.int32, s.shape, 1)
        s = jnp.where(col < n_valid, s, -1e30)

    # Softmax kept entirely in f32.
    s = s - jnp.max(s, axis=-1, keepdims=True)
    p = jnp.exp(s)
    denom = jnp.sum(p, axis=-1, keepdims=True)
    p = p * pl.reciprocal(denom, approx=True)              # EUP reciprocal

    attn_ref[0, 0] = p.astype(attn_ref.dtype)              # lane-dense (tq, Np) store

    pv = jnp.dot(p.astype(mxu_dtype), v,
                 preferred_element_type=jnp.float32)       # (tq, hd)
    contrib = jnp.dot(pv.astype(mxu_dtype), wproj_ref[0],
                      preferred_element_type=jnp.float32)  # (tq, C) = out_h @ Wproj_h

    @pl.when(h == 0)
    def _init():
        y_acc_ref[...] = jnp.broadcast_to(bproj_ref[...], y_acc_ref.shape)

    y_acc_ref[...] += contrib

    @pl.when(h == heads - 1)
    def _finalize():
        y_ref[0] = y_acc_ref[...].astype(y_ref.dtype)


def attention_pallas(x, w_qkv, b_qkv, w_proj, b_proj, heads,
                     *, q_tile=256, mxu_dtype=jnp.bfloat16):
    B, N, C = x.shape
    assert C % heads == 0
    head_dim = C // heads
    scale = head_dim ** (-0.5)

    # Pad token dim to a multiple of 128 so attn stores are lane-dense and the
    # MXU M/N dims are full.  Clamp the q tile so it divides n_pad.
    n_pad = ((N + 127) // 128) * 128
    tq = min(q_tile, n_pad)
    while n_pad % tq != 0:
        tq -= 128
    assert tq >= 128 and n_pad % tq == 0
    n_qt = n_pad // tq

    x_p = x if n_pad == N else jnp.pad(x, ((0, 0), (0, n_pad - N), (0, 0)))

    # Per-head parameter slabs.  Weights are pre-cast to the MXU operand dtype
    # (halves their per-step DMA when bf16); biases stay f32 (added to f32 acc).
    # torch qkv columns are laid out as (3, heads, hd).
    w_qkv_r = (w_qkv.reshape(C, 3, heads, head_dim)
               .transpose(2, 0, 1, 3)                      # (H, C, 3, hd)
               .reshape(heads, C, 3 * head_dim)
               .astype(mxu_dtype))
    b_qkv_r = (b_qkv.reshape(3, heads, head_dim)
               .transpose(1, 0, 2)
               .reshape(heads, 1, 3 * head_dim))
    w_proj_r = w_proj.reshape(heads, head_dim, C).astype(mxu_dtype)
    b_proj_r = jnp.reshape(b_proj, (1, C))

    # ---- pass 1: QKV projection, once per (batch, head) ----
    qkv_kernel = functools.partial(_qkv_proj_kernel, head_dim=head_dim,
                                   scale=scale, mxu_dtype=mxu_dtype)
    q, k, v = pl.pallas_call(
        qkv_kernel,
        out_shape=tuple(
            jax.ShapeDtypeStruct((B, heads, n_pad, head_dim), mxu_dtype)
            for _ in range(3)),
        grid_spec=pltpu.PrefetchScalarGridSpec(
            num_scalar_prefetch=0,
            grid=(B, heads),
            in_specs=[
                pl.BlockSpec((1, n_pad, C), lambda b, h: (b, 0, 0)),
                pl.BlockSpec((1, C, 3 * head_dim), lambda b, h: (h, 0, 0)),
                pl.BlockSpec((1, 1, 3 * head_dim), lambda b, h: (h, 0, 0)),
            ],
            out_specs=[
                pl.BlockSpec((1, 1, n_pad, head_dim), lambda b, h: (b, h, 0, 0))
                for _ in range(3)
            ],
        ),
        compiler_params=pltpu.CompilerParams(
            dimension_semantics=("parallel", "parallel")),
    )(x_p, w_qkv_r, b_qkv_r)

    # ---- pass 2: attention + fused output projection ----
    attn_kernel = functools.partial(_attention_kernel, heads=heads,
                                    n_pad=n_pad, n_valid=N, mxu_dtype=mxu_dtype)
    y_p, attn_p = pl.pallas_call(
        attn_kernel,
        out_shape=(
            jax.ShapeDtypeStruct((B, n_pad, C), x.dtype),
            jax.ShapeDtypeStruct((B, heads, n_pad, n_pad), jnp.float32),
        ),
        grid_spec=pltpu.PrefetchScalarGridSpec(
            num_scalar_prefetch=0,
            grid=(B, n_qt, heads),
            in_specs=[
                # q: one tile of one head
                pl.BlockSpec((1, 1, tq, head_dim), lambda b, qi, h: (b, h, qi, 0)),
                # k, v: full (padded) sequence for one head
                pl.BlockSpec((1, 1, n_pad, head_dim), lambda b, qi, h: (b, h, 0, 0)),
                pl.BlockSpec((1, 1, n_pad, head_dim), lambda b, qi, h: (b, h, 0, 0)),
                # per-head projection rows, projection bias
                pl.BlockSpec((1, head_dim, C), lambda b, qi, h: (h, 0, 0)),
                pl.BlockSpec((1, C), lambda b, qi, h: (0, 0)),
            ],
            out_specs=[
                # y block constant across the innermost (heads) reduction axis.
                pl.BlockSpec((1, tq, C), lambda b, qi, h: (b, qi, 0)),
                # one head / one q-tile of attention per step; lane dim = n_pad.
                pl.BlockSpec((1, 1, tq, n_pad), lambda b, qi, h: (b, h, qi, 0)),
            ],
            scratch_shapes=[pltpu.VMEM((tq, C), jnp.float32)],   # y accumulator
        ),
        compiler_params=pltpu.CompilerParams(
            dimension_semantics=("parallel", "parallel", "arbitrary")),
    )(q, k, v, w_proj_r, b_proj_r)

    # Only strip padding when N was actually padded (avoids a full attn copy
    # for sequence lengths that are already multiples of 128).
    if n_pad == N:
        return y_p, attn_p
    return y_p[:, :N, :], attn_p[:, :, :N, :N]


def attention_reference(x, w_qkv, b_qkv, w_proj, b_proj, heads):
    """Pure-JAX reference mirroring the PyTorch forward (dropout = identity)."""
    B, N, C = x.shape
    hd = C // heads
    scale = hd ** (-0.5)
    qkv = x @ w_qkv + b_qkv                                     # (B, N, 3C)
    qkv = qkv.reshape(B, N, 3, heads, hd).transpose(2, 0, 3, 1, 4)
    q, k, v = qkv[0], qkv[1], qkv[2]                            # (B, H, N, hd)
    attn = jnp.einsum("bhnd,bhmd->bhnm", q, k) * scale
    attn = jax.nn.softmax(attn, axis=-1)
    y = jnp.einsum("bhnm,bhmd->bhnd", attn, v)                  # (B, H, N, hd)
    y = y.transpose(0, 2, 1, 3).reshape(B, N, C)
    y = y @ w_proj + b_proj
    return y, attn


if __name__ == "__main__":
    # TODO(synk): attn_drop / proj_drop are eval-mode identity (no dropout RNG in-kernel).
    B, N, C, heads = 2, 8, 32, 4

    key = jax.random.PRNGKey(0)
    kx, k1, k2, k3, k4 = jax.random.split(key, 5)

    x = jax.random.normal(kx, (B, N, C), dtype=jnp.float32)

    bound = 1.0 / np.sqrt(C)
    w_qkv = jax.random.uniform(k1, (C, 3 * C), jnp.float32, -bound, bound)
    b_qkv = jax.random.uniform(k2, (3 * C,), jnp.float32, -bound, bound)
    w_proj = jax.random.uniform(k3, (C, C), jnp.float32, -bound, bound)
    b_proj = jax.random.uniform(k4, (C,), jnp.float32, -bound, bound)

    y, attn = attention_pallas(x, w_qkv, b_qkv, w_proj, b_proj, heads)
    y = jax.block_until_ready(y)
    attn = jax.block_until_ready(attn)

    y_ref, attn_ref = attention_reference(x, w_qkv, b_qkv, w_proj, b_proj, heads)
    # bf16 MXU operands (f32 accumulation) -> tolerance loosened vs. pure f32.
    np.testing.assert_allclose(np.asarray(attn), np.asarray(attn_ref), atol=1e-2, rtol=1e-2)
    np.testing.assert_allclose(np.asarray(y), np.asarray(y_ref), atol=1e-2, rtol=1e-2)

    print("KERNEL_OK")
</pallas_src>

<mosaic_0001>
module attributes {stable_mosaic.version = 11 : i64} {
  func.func @_qkv_proj_kernel(%arg0: i32, %arg1: i32, %arg2: memref<1x128x32xf32, #tpu.memory_space<vmem>>, %arg3: memref<1x32x24xbf16, #tpu.memory_space<vmem>>, %arg4: memref<1x1x24xf32, #tpu.memory_space<vmem>>, %arg5: memref<1x1x128x8xbf16, #tpu.memory_space<vmem>>, %arg6: memref<1x1x128x8xbf16, #tpu.memory_space<vmem>>, %arg7: memref<1x1x128x8xbf16, #tpu.memory_space<vmem>>) attributes {dimension_semantics = [#tpu.dimension_semantics<parallel>, #tpu.dimension_semantics<parallel>], iteration_bounds = array<i64: 2, 4>, scalar_prefetch = 0 : i64, scratch_operands = 0 : i64, tpu.core_type = #tpu.core_type<tc>, window_params = [{transform_indices = @transform_0, window_bounds = array<i64: 1, 128, 32>}, {transform_indices = @transform_1, window_bounds = array<i64: 1, 32, 24>}, {transform_indices = @transform_2, window_bounds = array<i64: 1, 1, 24>}, {transform_indices = @transform_3, window_bounds = array<i64: 1, 1, 128, 8>}, {transform_indices = @transform_4, window_bounds = array<i64: 1, 1, 128, 8>}, {transform_indices = @transform_5, window_bounds = array<i64: 1, 1, 128, 8>}]} {
    %c0 = arith.constant 0 : index
    %c0_0 = arith.constant 0 : index
    %c0_1 = arith.constant 0 : index
    %0 = vector.load %arg2[%c0, %c0_0, %c0_1] : memref<1x128x32xf32, #tpu.memory_space<vmem>>, vector<1x128x32xf32>
    %1 = vector.shape_cast %0 : vector<1x128x32xf32> to vector<128x32xf32>
    %2 = arith.truncf %1 : vector<128x32xf32> to vector<128x32xbf16>
    %c0_2 = arith.constant 0 : index
    %c0_3 = arith.constant 0 : index
    %c0_4 = arith.constant 0 : index
    %3 = vector.load %arg3[%c0_2, %c0_3, %c0_4] : memref<1x32x24xbf16, #tpu.memory_space<vmem>>, vector<1x32x24xbf16>
    %4 = vector.shape_cast %3 : vector<1x32x24xbf16> to vector<32x24xbf16>
    %cst = arith.constant dense<0.000000e+00> : vector<128x24xf32>
    %5 = tpu.matmul %2, %4, %cst {dimension_numbers = #tpu.dot_dimension_numbers<[1], [0], [0], [1], [0, 0, 1, 1], [], []>} : vector<128x32xbf16>, vector<32x24xbf16>, vector<128x24xf32> -> vector<128x24xf32>
    %c0_5 = arith.constant 0 : index
    %c0_6 = arith.constant 0 : index
    %c0_7 = arith.constant 0 : index
    %6 = vector.load %arg4[%c0_5, %c0_6, %c0_7] : memref<1x1x24xf32, #tpu.memory_space<vmem>>, vector<1x1x24xf32>
    %7 = vector.shape_cast %6 : vector<1x1x24xf32> to vector<1x24xf32>
    %8 = vector.broadcast %7 : vector<1x24xf32> to vector<128x24xf32>
    %9 = arith.addf %5, %8 : vector<128x24xf32>
    %10 = vector.extract_strided_slice %9 {offsets = [0, 0], sizes = [128, 8], strides = [1, 1]} : vector<128x24xf32> to vector<128x8xf32>
    %cst_8 = arith.constant 0.353553385 : f32
    %11 = vector.broadcast %cst_8 : f32 to vector<128x8xf32>
    %12 = arith.mulf %10, %11 : vector<128x8xf32>
    %13 = arith.truncf %12 : vector<128x8xf32> to vector<128x8xbf16>
    %c0_9 = arith.constant 0 : index
    %c0_10 = arith.constant 0 : index
    %c0_11 = arith.constant 0 : index
    %c0_12 = arith.constant 0 : index
    %14 = vector.load %arg5[%c0_9, %c0_10, %c0_11, %c0_12] : memref<1x1x128x8xbf16, #tpu.memory_space<vmem>>, vector<1x1x128x8xbf16>
    %15 = vector.shape_cast %14 : vector<1x1x128x8xbf16> to vector<128x8xbf16>
    %16 = vector.shape_cast %13 : vector<128x8xbf16> to vector<1x1x128x8xbf16>
    tpu.vector_store %arg5[%c0_9, %c0_10, %c0_11, %c0_12], %16 {strides = array<i32>} : memref<1x1x128x8xbf16, #tpu.memory_space<vmem>>, vector<1x1x128x8xbf16>,
    %17 = vector.extract_strided_slice %9 {offsets = [0, 8], sizes = [128, 8], strides = [1, 1]} : vector<128x24xf32> to vector<128x8xf32>
    %18 = arith.truncf %17 : vector<128x8xf32> to vector<128x8xbf16>
    %c0_13 = arith.constant 0 : index
    %c0_14 = arith.constant 0 : index
    %c0_15 = arith.constant 0 : index
    %c0_16 = arith.constant 0 : index
    %19 = vector.load %arg6[%c0_13, %c0_14, %c0_15, %c0_16] : memref<1x1x128x8xbf16, #tpu.memory_space<vmem>>, vector<1x1x128x8xbf16>
    %20 = vector.shape_cast %19 : vector<1x1x128x8xbf16> to vector<128x8xbf16>
    %21 = vector.shape_cast %18 : vector<128x8xbf16> to vector<1x1x128x8xbf16>
    tpu.vector_store %arg6[%c0_13, %c0_14, %c0_15, %c0_16], %21 {strides = array<i32>} : memref<1x1x128x8xbf16, #tpu.memory_space<vmem>>, vector<1x1x128x8xbf16>,
    %22 = vector.extract_strided_slice %9 {offsets = [0, 16], sizes = [128, 8], strides = [1, 1]} : vector<128x24xf32> to vector<128x8xf32>
    %23 = arith.truncf %22 : vector<128x8xf32> to vector<128x8xbf16>
    %c0_17 = arith.constant 0 : index
    %c0_18 = arith.constant 0 : index
    %c0_19 = arith.constant 0 : index
    %c0_20 = arith.constant 0 : index
    %24 = vector.load %arg7[%c0_17, %c0_18, %c0_19, %c0_20] : memref<1x1x128x8xbf16, #tpu.memory_space<vmem>>, vector<1x1x128x8xbf16>
    %25 = vector.shape_cast %24 : vector<1x1x128x8xbf16> to vector<128x8xbf16>
    %26 = vector.shape_cast %23 : vector<128x8xbf16> to vector<1x1x128x8xbf16>
    tpu.vector_store %arg7[%c0_17, %c0_18, %c0_19, %c0_20], %26 {strides = array<i32>} : memref<1x1x128x8xbf16, #tpu.memory_space<vmem>>, vector<1x1x128x8xbf16>,
    return
  }
  func.func @transform_0(%arg0: i32, %arg1: i32) -> (i32, i32, i32) {
    %c0_i32 = arith.constant 0 : i32
    %c0_i32_0 = arith.constant 0 : i32
    %c0_i32_1 = arith.constant 0 : i32
    return %arg0, %c0_i32, %c0_i32_0 : i32, i32, i32
  }
  func.func @transform_1(%arg0: i32, %arg1: i32) -> (i32, i32, i32) {
    %c0_i32 = arith.constant 0 : i32
    %c0_i32_0 = arith.constant 0 : i32
    %c0_i32_1 = arith.constant 0 : i32
    return %arg1, %c0_i32, %c0_i32_0 : i32, i32, i32
  }
  func.func @transform_2(%arg0: i32, %arg1: i32) -> (i32, i32, i32) {
    %c0_i32 = arith.constant 0 : i32
    %c0_i32_0 = arith.constant 0 : i32
    %c0_i32_1 = arith.constant 0 : i32
    return %arg1, %c0_i32, %c0_i32_0 : i32, i32, i32
  }
  func.func @transform_3(%arg0: i32, %arg1: i32) -> (i32, i32, i32, i32) {
    %c0_i32 = arith.constant 0 : i32
    %c0_i32_0 = arith.constant 0 : i32
    %c0_i32_1 = arith.constant 0 : i32
    return %arg0, %arg1, %c0_i32, %c0_i32_0 : i32, i32, i32, i32
  }
  func.func @transform_4(%arg0: i32, %arg1: i32) -> (i32, i32, i32, i32) {
    %c0_i32 = arith.constant 0 : i32
    %c0_i32_0 = arith.constant 0 : i32
    %c0_i32_1 = arith.constant 0 : i32
    return %arg0, %arg1, %c0_i32, %c0_i32_0 : i32, i32, i32, i32
  }
  func.func @transform_5(%arg0: i32, %arg1: i32) -> (i32, i32, i32, i32) {
    %c0_i32 = arith.constant 0 : i32
    %c0_i32_0 = arith.constant 0 : i32
    %c0_i32_1 = arith.constant 0 : i32
    return %arg0, %arg1, %c0_i32, %c0_i32_0 : i32, i32, i32, i32
  }
}

</mosaic_0001>

<bundles_post_ra>
// kernel: tpu_custom_call.1
= control target key start
LH: loop header
LB: loop body
LE: loop exit
PB: predicated region body
PF: predicated region fallthrough
CT: control target
= control target key end

     0   :  { %s1229_s18 = smov 0   ;;  %s1231_s19 = smov 0   ;;  %s1517_s0 = inlined_call_operand.vmem [shape: f32[2,128,32], index: 0, kind: input, shape index: {}]   ;;  %s1518_s1 = inlined_call_operand.vmem [shape: bf16[4,32,24], index: 1, kind: input, shape index: {}]   ;;  %s1519_s2 = inlined_call_operand.vmem [shape: f32[4,1,24], index: 2, kind: input, shape index: {}]   ;;  %s1520_s3 = inlined_call_operand.vmem [shape: bf16[2,4,128,8], index: 3, kind: output, shape index: {0}]   ;;  %s1521_s4 = inlined_call_operand.vmem [shape: bf16[2,4,128,8], index: 4, kind: output, shape index: {1}]   ;;  %s1522_s5 = inlined_call_operand.vmem [shape: bf16[2,4,128,8], index: 5, kind: output, shape index: {2}]  }
   0x1   :  { %s1233_s20 = smov 0   ;;  %s1235_s21 = smov 0  }
   0x2   :  { %s1237_s22 = smov 0  }
   0x3 LB: > { %s25_s23 = sadd.s32 1, %s1187_s20  ;;  %s28_s24 = sadd.s32 1, %s1191_s21  ;;  %s1195_s22 = sphi %s1237_s22, %s16_s22   ;;  %s1191_s21 = sphi %s1235_s21, %s1526_s21   ;;  %s1187_s20 = sphi %s1233_s20, %s1525_s20   ;;  %s1183_s19 = sphi %s1231_s19, %s1524_s19   ;;  %s1179_s18 = sphi %s1229_s18, %s1523_s18  }
   0x4   : > { %p26_p0 = scmp.ge.s32.totalorder %s25_s23, 4  ;;  %p986_p1 = scmp.ge.s32.totalorder %s1195_s22, 1 }
   0x5   : > { %p228_p2 = scmp.lt.s32.totalorder %s1195_s22, 9 }
   0x6   : > { %s1528_s23 = smov (%p26_p0, %s25_s23), 0  ;;  %s1530_s24 = smov (!%p26_p0, %s28_s24), %s1191_s21 }
   0x7   : > { %p229_p3 = pnand %p986_p1, %p228_p2  ;;  %p30_p4 = scmp.ge.s32.totalorder %s1530_s24, 2 }
   0x8   : > { %p286_p5 = scmp.lt.s32.totalorder (!%p229_p3), %s1183_s19, 1  ;;  %p291_p6 = scmp.lt.s32.totalorder (!%p229_p3), %s1179_s18, 3  ;;  %vm374_vm0 = vcmask (!%p229_p3), 261120   ;;  %vm576_vm1 = vcmask (!%p229_p3), 60416  }
   0x9   : > { %s1532_s24 = smov (%p30_p4, %s1530_s24), 0  ;;  %232 = sbr.rel (%p229_p3) target bundleno = 425 (0x1a9), region = 32 }
   0xa   : > { %s1197_s17 = smov (!%p229_p3), 120  }
  0x10   : > { %s1534_s19 = smov (!%p286_p5, %s1183_s19), 1  ;;  %s1536_s18 = smov (!%p291_p6, %s1179_s18), 3 }
  0x11   : > { %s1045_s25 = sshll.u32 %s1534_s19, 7  ;;  %s992_s26 = sshll.u32 %s1534_s19, 6 }
  0x12   : > { %s1264_s29 = scalar_lea.vmem %s1517_s0, %s1045_s25  ;;  %s1046_s30 = sshll.u32 %s1536_s18, 4 }
  0x13   : > { %s295_s8 = scalar_lea.vmem %s1518_s1, %s1046_s30  ;;  %v327_v0 = vld [vmem:[%s1264_s29] sm:$0xff]  ;;  %v328_v1 = vld [vmem:[%s1264_s29 + $0x8] sm:$0xff]  ;;  %s1273_s9 = sadd.s32 %s1046_s30, %s992_s26  ;;  %v329_v7 = vld [vmem:[%s1264_s29 + $0x10] sm:$0xff] }
  0x14   : > { %v335_v2 = vld [vmem:[%s1264_s29 + $0x40] sm:$0xff]  ;;  %v1156_v4 = vld [vmem:[%s295_s8 + $0x8] sm:$0xff]   ;;  %v343_v5 = vpack.c.bf16 %v328_v1, %v327_v0  ;;  %v330_v9 = vld [vmem:[%s1264_s29 + $0x18] sm:$0xff]  ;;  %s298_s12 = scalar_lea.vmem %s1519_s2, %s1536_s18  ;;  %s1303_s13 = sshll.u32 %s1273_s9, 2 }
  0x15   : > { %v1155_v3 = vld [vmem:[%s295_s8] sm:$0xff]   ;;  %v336_v6 = vld [vmem:[%s1264_s29 + $0x48] sm:$0xff]  ;;  %v337_v10 = vld [vmem:[%s1264_s29 + $0x50] sm:$0xff]  ;;  %v344_v16 = vpack.c.bf16 %v330_v9, %v329_v7  ;;  %s1321_s16 = scalar_lea.vmem %s1520_s3, %s1303_s13  ;;  %s1198_s18 = smov 112  }
  0x16   : > { %1089 = vmatprep.subr.bf16.mxu0 %v1155_v3  ;;  %1109 = vmatprep.subr.bf16.mxu1 %v1155_v3  ;;  %v347_v8 = vpack.c.bf16 %v336_v6, %v335_v2  ;;  %v338_v11 = vld [vmem:[%s1264_s29 + $0x58] sm:$0xff]  ;;  %v331_v12 = vld [vmem:[%s1264_s29 + $0x20] sm:$0xff]  ;;  %v332_v13 = vld [vmem:[%s1264_s29 + $0x28] sm:$0xff]  ;;  %s1430_s26 = scalar_lea.vmem %s1521_s4, %s1303_s13 }
  0x17   : > { %1090 = vmatpush3.bf16.msra.mxu0 %v1155_v3  ;;  %1111 = vmatpush3.bf16.msra.mxu1 %v1155_v3  ;;  %v339_v14 = vld [vmem:[%s1264_s29 + $0x60] sm:$0xff]  ;;  %v340_v15 = vld [vmem:[%s1264_s29 + $0x68] sm:$0xff]  ;;  %v348_v17 = vpack.c.bf16 %v338_v11, %v337_v10  ;;  %v345_v18 = vpack.c.bf16 %v332_v13, %v331_v12  ;;  %v333_v20 = vld [vmem:[%s1264_s29 + $0x30] sm:$0xff] }
  0x18   : > { %1091 = vmatprep.subr.bf16.mxu0 %v1156_v4  ;;  %1110 = vmatprep.subr.bf16.mxu1 %v1156_v4  ;;  %v349_v19 = vpack.c.bf16 %v340_v15, %v339_v14  ;;  %v334_v21 = vld [vmem:[%s1264_s29 + $0x38] sm:$0xff]  ;;  %v341_v22 = vld [vmem:[%s1264_s29 + $0x70] sm:$0xff]  ;;  %v1300_v26 = vld [vmem:[%s298_s12] ss:$0 sm:$0xff] }
  0x19   : > { %1093 = vmatprep.mubr.msk.bf16.mxu0 %vm374_vm0, %v343_v5  ;;  %1101 = vmatprep.mubr.msk.bf16.mxu1 %vm374_vm0, %v347_v8  ;;  %v342_v23 = vld [vmem:[%s1264_s29 + $0x78] sm:$0xff]  ;;  %v346_v24 = vpack.c.bf16 %v334_v21, %v333_v20  ;;  %s1438_s29 = scalar_lea.vmem %s1522_s5, %s1303_s13 }
  0x1a   : > { %v350_v25 = vpack.c.bf16 %v342_v23, %v341_v22 }
  0x1b   : > { %1092 = vmatpush3.bf16.msra.mxu0 %v1156_v4  ;;  %1112 = vmatpush3.bf16.msra.mxu1 %v1156_v4 }
  0x1e   : > { %1094 = vmatmul.mubr.msk.bf16.vlgmr.msra.gmra.mrb[0].mxu0 %vm374_vm0, %v344_v16  ;;  %1102 = vmatmul.mubr.msk.bf16.vlgmr.msra.gmra.mrb[0].mxu1 %vm374_vm0, %v348_v17 }
  0x1f   : > { %1097 = vmatprep.mubr.msk.bf16.mxu0 %vm374_vm0, %v345_v18  ;;  %1105 = vmatprep.mubr.msk.bf16.mxu1 %vm374_vm0, %v349_v19 }
  0x26   : > { %1098 = vmatmul.mubr.msk.bf16.gmra.mrb[4].mxu0 %vm374_vm0, %v346_v24  ;;  %1106 = vmatmul.mubr.msk.bf16.gmra.mrb[4].mxu1 %vm374_vm0, %v350_v25 }
  0xf1   : > { %v1095_v27 = vpop.f32.mrb[0].mxu0  ;;  %v1103_v28 = vpop.f32.mrb[0].mxu1 }
  0xf2   : > { %v442_v29 = vadd.f32 %v1095_v27, %v1300_v26  ;;  %v474_v30 = vadd.f32 %v1103_v28, %v1300_v26  ;;  %v433_v31 = vpop.f32.mrb[1].mxu0  ;;  %v465_v32 = vpop.f32.mrb[1].mxu1 }
  0xf3   : > { %v1308_v33 = vadd.f32 %v1300_v26, %v433_v31  ;;  %v1311_v34 = vadd.f32 %v1300_v26, %v465_v32  ;;  %v1096_v35 = vpop.f32.mrb[2].mxu0  ;;  %v1104_v36 = vpop.f32.mrb[2].mxu1 }
  0xf4   : > { %v498_v37 = vmul.f32 0.35355338, %v442_v29  ;;  %v506_v38 = vmul.f32 0.35355338, %v474_v30  ;;  %v445_v39 = vadd.f32 %v1096_v35, %v1300_v26  ;;  %v1315_v40 = vadd.f32 %v1104_v36, %v1300_v26  ;;  %v436_v41 = vpop.f32.mrb[3].mxu0  ;;  %v468_v42 = vpop.f32.mrb[3].mxu1 }
  0xf5   : > { %v496_v43 = vmul.f32 0.35355338, %v1308_v33  ;;  %v504_v44 = vmul.f32 0.35355338, %v1311_v34  ;;  %v1331_v52 = vadd.f32 %v1300_v26, %v436_v41  ;;  %v1334_v53 = vadd.f32 %v1300_v26, %v468_v42 }
  0xf6   : > { %v1049_v45 = vpack.c.bf16 %v498_v37, %v498_v37  ;;  %v1057_v46 = vpack.c.bf16 %v506_v38, %v506_v38  ;;  %v499_v47 = vmul.f32 0.35355338, %v445_v39  ;;  %v507_v50 = vmul.f32 0.35355338, %v1315_v40 }
  0xf7   : > { %v1047_v48 = vpack.c.bf16 %v496_v43, %v496_v43  ;;  %v1055_v49 = vpack.c.bf16 %v504_v44, %v504_v44  ;;  %v1073_v54 = vpack.c.bf16 %v474_v30, %v474_v30  ;;  %v1065_v56 = vpack.c.bf16 %v442_v29, %v442_v29 }
  0xf8   : > { %579 = vst.msk [vmem:[%s1321_s16 + $0x8] sm:$0xf] %vm576_vm1, %v1049_v45  ;;  %587 = vst.msk [vmem:[%s1321_s16 + $0x28] sm:$0xf] %vm576_vm1, %v1057_v46  ;;  %v1050_v51 = vpack.c.bf16 %v499_v47, %v499_v47  ;;  %v1058_v55 = vpack.c.bf16 %v507_v50, %v507_v50  ;;  %v497_v59 = vmul.f32 0.35355338, %v1331_v52  ;;  %v1066_v11 = vpack.c.bf16 %v445_v39, %v445_v39 }
  0xf9   : > { %577 = vst.msk [vmem:[%s1321_s16] sm:$0xf] %vm576_vm1, %v1047_v48  ;;  %585 = vst.msk [vmem:[%s1321_s16 + $0x20] sm:$0xf] %vm576_vm1, %v1055_v49  ;;  %v1099_v57 = vpop.f32.mrb[4].mxu0  ;;  %v1107_v58 = vpop.f32.mrb[4].mxu1  ;;  %661 = vrot.lane.b32.xlu0 %v1073_v54, %s1197_s17  ;;  %645 = vrot.lane.b32.xlu1 %v1065_v56, %s1197_s17  ;;  %v1074_v23 = vpack.c.bf16 %v1315_v40, %v1315_v40  ;;  %v1063_v30 = vpack.c.bf16 %v1308_v33, %v1308_v33 }
  0xfa   : > { %580 = vst.msk [vmem:[%s1321_s16 + $0xc] sm:$0xf] %vm576_vm1, %v1050_v51  ;;  %v505_v60 = vmul.f32 0.35355338, %v1334_v53  ;;  %v449_v61 = vpop.f32.mrb[5].mxu0  ;;  %v481_v62 = vpop.f32.mrb[5].mxu1  ;;  %v458_v63 = vadd.f32 %v1099_v57, %v1300_v26  ;;  %v490_v2 = vadd.f32 %v1107_v58, %v1300_v26  ;;  %v1048_v5 = vpack.c.bf16 %v497_v59, %v497_v59 }
  0xfb   : > { %588 = vst.msk [vmem:[%s1321_s16 + $0x2c] sm:$0xf] %vm576_vm1, %v1058_v55  ;;  %v1350_v0 = vadd.f32 %v1300_v26, %v449_v61  ;;  %v1100_v1 = vpop.f32.mrb[6].mxu0  ;;  %v1354_v3 = vadd.f32 %v1300_v26, %v481_v62  ;;  %v1108_v4 = vpop.f32.mrb[6].mxu1  ;;  %v1072_v33 = vpack.c.bf16 %v1334_v53, %v1334_v53  ;;  %v1064_v35 = vpack.c.bf16 %v1331_v52, %v1331_v52 }
  0xfc   : > { %v1056_v6 = vpack.c.bf16 %v505_v60, %v505_v60  ;;  %v461_v7 = vadd.f32 %v1100_v1, %v1300_v26  ;;  %v452_v8 = vpop.f32.mrb[7].mxu0  ;;  %v493_v9 = vadd.f32 %v1108_v4, %v1300_v26  ;;  %v484_v10 = vpop.f32.mrb[7].mxu1  ;;  %v502_v12 = vmul.f32 0.35355338, %v458_v63  ;;  %578 = vst.msk [vmem:[%s1321_s16 + $0x4] sm:$0xf] %vm576_vm1, %v1048_v5 }
  0xfd   : > { %v500_v13 = vmul.f32 0.35355338, %v1350_v0  ;;  %709 = vrot.lane.b32.xlu0 %v1065_v56, %s1198_s18  ;;  %v453_v15 = vadd.f32 %v1300_v26, %v452_v8  ;;  %v510_v16 = vmul.f32 0.35355338, %v490_v2  ;;  %647 = vrot.lane.b32.xlu1 %v1066_v11, %s1197_s17  ;;  %v508_v19 = vmul.f32 0.35355338, %v1354_v3 }
  0xfe   : > { %586 = vst.msk [vmem:[%s1321_s16 + $0x24] sm:$0xf] %vm576_vm1, %v1056_v6  ;;  %v503_v14 = vmul.f32 0.35355338, %v461_v7  ;;  %v1053_v17 = vpack.c.bf16 %v502_v12, %v502_v12  ;;  %v511_v25 = vmul.f32 0.35355338, %v493_v9  ;;  %v485_v28 = vadd.f32 %v1300_v26, %v484_v10 }
  0xff   : > { %v1051_v18 = vpack.c.bf16 %v500_v13, %v500_v13  ;;  %v501_v21 = vmul.f32 0.35355338, %v453_v15  ;;  %v1061_v22 = vpack.c.bf16 %v510_v16, %v510_v16  ;;  %v1059_v24 = vpack.c.bf16 %v508_v19, %v508_v19 }
 0x100   : > { %v1054_v20 = vpack.c.bf16 %v503_v14, %v503_v14  ;;  %583 = vst.msk [vmem:[%s1321_s16 + $0x18] sm:$0xf] %vm576_vm1, %v1053_v17  ;;  %v1062_v29 = vpack.c.bf16 %v511_v25, %v511_v25  ;;  %v509_v31 = vmul.f32 0.35355338, %v485_v28  ;;  %v1071_v26 = vpack.c.bf16 %v1311_v34, %v1311_v34 }
 0x101   : > { %581 = vst.msk [vmem:[%s1321_s16 + $0x10] sm:$0xf] %vm576_vm1, %v1051_v18  ;;  %725 = vrot.lane.b32.xlu0 %v1073_v54, %s1198_s18  ;;  %v1052_v27 = vpack.c.bf16 %v501_v21, %v501_v21  ;;  %591 = vst.msk [vmem:[%s1321_s16 + $0x38] sm:$0xf] %vm576_vm1, %v1061_v22  ;;  %663 = vrot.lane.b32.xlu1 %v1074_v23, %s1197_s17  ;;  %v1069_v34 = vpack.c.bf16 %v458_v63, %v458_v63 }
 0x102   : > { %584 = vst.msk [vmem:[%s1321_s16 + $0x1c] sm:$0xf] %vm576_vm1, %v1054_v20  ;;  %589 = vst.msk [vmem:[%s1321_s16 + $0x30] sm:$0xf] %vm576_vm1, %v1059_v24  ;;  %v1060_v32 = vpack.c.bf16 %v509_v31, %v509_v31  ;;  %v1070_v36 = vpack.c.bf16 %v461_v7, %v461_v7  ;;  %v1077_v37 = vpack.c.bf16 %v490_v2, %v490_v2 }
 0x103   : > { %582 = vst.msk [vmem:[%s1321_s16 + $0x14] sm:$0xf] %vm576_vm1, %v1052_v27  ;;  %592 = vst.msk [vmem:[%s1321_s16 + $0x3c] sm:$0xf] %vm576_vm1, %v1062_v29  ;;  %v1078_v38 = vpack.c.bf16 %v493_v9, %v493_v9  ;;  %v1067_v39 = vpack.c.bf16 %v1350_v0, %v1350_v0  ;;  %v1068_v40 = vpack.c.bf16 %v453_v15, %v453_v15 }
 0x104   : > { %590 = vst.msk [vmem:[%s1321_s16 + $0x34] sm:$0xf] %vm576_vm1, %v1060_v32  ;;  %v1075_v41 = vpack.c.bf16 %v1354_v3, %v1354_v3  ;;  %v1076_v42 = vpack.c.bf16 %v485_v28, %v485_v28 }
 0x105   : > { %641 = vrot.lane.b32.xlu0 %v1063_v30, %s1197_s17  ;;  %711 = vrot.lane.b32.xlu1 %v1066_v11, %s1198_s18 }
 0x109   : > { %657 = vrot.lane.b32.xlu0 %v1071_v26, %s1197_s17  ;;  %727 = vrot.lane.b32.xlu1 %v1074_v23, %s1198_s18 }
 0x10d   : > { %705 = vrot.lane.b32.xlu0 %v1063_v30, %s1198_s18  ;;  %659 = vrot.lane.b32.xlu1 %v1072_v33, %s1197_s17 }
 0x111   : > { %721 = vrot.lane.b32.xlu0 %v1071_v26, %s1198_s18  ;;  %707 = vrot.lane.b32.xlu1 %v1064_v35, %s1198_s18 }
 0x115   : > { %643 = vrot.lane.b32.xlu0 %v1064_v35, %s1197_s17  ;;  %723 = vrot.lane.b32.xlu1 %v1072_v33, %s1198_s18 }
 0x119   : > { %653 = vrot.lane.b32.xlu0 %v1069_v34, %s1197_s17  ;;  %655 = vrot.lane.b32.xlu1 %v1070_v36, %s1197_s17 }
 0x11d   : > { %669 = vrot.lane.b32.xlu0 %v1077_v37, %s1197_s17  ;;  %671 = vrot.lane.b32.xlu1 %v1078_v38, %s1197_s17 }
 0x121   : > { %717 = vrot.lane.b32.xlu0 %v1069_v34, %s1198_s18  ;;  %719 = vrot.lane.b32.xlu1 %v1070_v36, %s1198_s18 }
 0x125   : > { %649 = vrot.lane.b32.xlu0 %v1067_v39, %s1197_s17  ;;  %651 = vrot.lane.b32.xlu1 %v1068_v40, %s1197_s17 }
 0x129   : > { %665 = vrot.lane.b32.xlu0 %v1075_v41, %s1197_s17  ;;  %667 = vrot.lane.b32.xlu1 %v1076_v42, %s1197_s17 }
 0x12d   : > { %713 = vrot.lane.b32.xlu0 %v1067_v39, %s1198_s18  ;;  %715 = vrot.lane.b32.xlu1 %v1068_v40, %s1198_s18 }
 0x131   : > { %729 = vrot.lane.b32.xlu0 %v1075_v41, %s1198_s18  ;;  %731 = vrot.lane.b32.xlu1 %v1076_v42, %s1198_s18 }
 0x135   : > { %733 = vrot.lane.b32.xlu0 %v1077_v37, %s1198_s18  ;;  %735 = vrot.lane.b32.xlu1 %v1078_v38, %s1198_s18 }
 0x16b   : > { %v662_v43 = vpop.permute.xlu0 %661  ;;  %v646_v44 = vpop.permute.xlu1 %645 }
 0x16c   : > { %699 = vst.msk [vmem:[%s1430_s26 + $0x28] sm:$0xf] %vm576_vm1, %v662_v43  ;;  %691 = vst.msk [vmem:[%s1430_s26 + $0x8] sm:$0xf] %vm576_vm1, %v646_v44 }
 0x16f   : > { %v710_v45 = vpop.permute.xlu0 %709  ;;  %v648_v46 = vpop.permute.xlu1 %647 }
 0x170   : > { %755 = vst.msk [vmem:[%s1438_s29 + $0x8] sm:$0xf] %vm576_vm1, %v710_v45  ;;  %692 = vst.msk [vmem:[%s1430_s26 + $0xc] sm:$0xf] %vm576_vm1, %v648_v46 }
 0x173   : > { %v726_v47 = vpop.permute.xlu0 %725  ;;  %v664_v48 = vpop.permute.xlu1 %663 }
 0x174   : > { %763 = vst.msk [vmem:[%s1438_s29 + $0x28] sm:$0xf] %vm576_vm1, %v726_v47  ;;  %700 = vst.msk [vmem:[%s1430_s26 + $0x2c] sm:$0xf] %vm576_vm1, %v664_v48 }
 0x177   : > { %v642_v49 = vpop.permute.xlu0 %641  ;;  %v712_v50 = vpop.permute.xlu1 %711 }
 0x178   : > { %689 = vst.msk [vmem:[%s1430_s26] sm:$0xf] %vm576_vm1, %v642_v49  ;;  %756 = vst.msk [vmem:[%s1438_s29 + $0xc] sm:$0xf] %vm576_vm1, %v712_v50 }
 0x17b   : > { %v658_v51 = vpop.permute.xlu0 %657  ;;  %v728_v52 = vpop.permute.xlu1 %727 }
 0x17c   : > { %697 = vst.msk [vmem:[%s1430_s26 + $0x20] sm:$0xf] %vm576_vm1, %v658_v51  ;;  %764 = vst.msk [vmem:[%s1438_s29 + $0x2c] sm:$0xf] %vm576_vm1, %v728_v52 }
 0x17f   : > { %v706_v53 = vpop.permute.xlu0 %705  ;;  %v660_v54 = vpop.permute.xlu1 %659 }
 0x180   : > { %753 = vst.msk [vmem:[%s1438_s29] sm:$0xf] %vm576_vm1, %v706_v53  ;;  %698 = vst.msk [vmem:[%s1430_s26 + $0x24] sm:$0xf] %vm576_vm1, %v660_v54 }
 0x183   : > { %v722_v55 = vpop.permute.xlu0 %721  ;;  %v708_v56 = vpop.permute.xlu1 %707 }
 0x184   : > { %761 = vst.msk [vmem:[%s1438_s29 + $0x20] sm:$0xf] %vm576_vm1, %v722_v55  ;;  %754 = vst.msk [vmem:[%s1438_s29 + $0x4] sm:$0xf] %vm576_vm1, %v708_v56 }
 0x187   : > { %v644_v57 = vpop.permute.xlu0 %643  ;;  %v724_v58 = vpop.permute.xlu1 %723 }
 0x188   : > { %690 = vst.msk [vmem:[%s1430_s26 + $0x4] sm:$0xf] %vm576_vm1, %v644_v57  ;;  %762 = vst.msk [vmem:[%s1438_s29 + $0x24] sm:$0xf] %vm576_vm1, %v724_v58 }
 0x18b   : > { %v654_v59 = vpop.permute.xlu0 %653  ;;  %v656_v60 = vpop.permute.xlu1 %655 }
 0x18c   : > { %695 = vst.msk [vmem:[%s1430_s26 + $0x18] sm:$0xf] %vm576_vm1, %v654_v59  ;;  %696 = vst.msk [vmem:[%s1430_s26 + $0x1c] sm:$0xf] %vm576_vm1, %v656_v60 }
 0x18f   : > { %v670_v61 = vpop.permute.xlu0 %669  ;;  %v672_v62 = vpop.permute.xlu1 %671 }
 0x190   : > { %703 = vst.msk [vmem:[%s1430_s26 + $0x38] sm:$0xf] %vm576_vm1, %v670_v61  ;;  %704 = vst.msk [vmem:[%s1430_s26 + $0x3c] sm:$0xf] %vm576_vm1, %v672_v62 }
 0x193   : > { %v718_v63 = vpop.permute.xlu0 %717  ;;  %v720_v0 = vpop.permute.xlu1 %719 }
 0x194   : > { %759 = vst.msk [vmem:[%s1438_s29 + $0x18] sm:$0xf] %vm576_vm1, %v718_v63  ;;  %760 = vst.msk [vmem:[%s1438_s29 + $0x1c] sm:$0xf] %vm576_vm1, %v720_v0 }
 0x197   : > { %v650_v1 = vpop.permute.xlu0 %649  ;;  %v652_v2 = vpop.permute.xlu1 %651 }
 0x198   : > { %693 = vst.msk [vmem:[%s1430_s26 + $0x10] sm:$0xf] %vm576_vm1, %v650_v1  ;;  %694 = vst.msk [vmem:[%s1430_s26 + $0x14] sm:$0xf] %vm576_vm1, %v652_v2 }
 0x19b   : > { %v666_v3 = vpop.permute.xlu0 %665  ;;  %v668_v4 = vpop.permute.xlu1 %667 }
 0x19c   : > { %701 = vst.msk [vmem:[%s1430_s26 + $0x30] sm:$0xf] %vm576_vm1, %v666_v3  ;;  %702 = vst.msk [vmem:[%s1430_s26 + $0x34] sm:$0xf] %vm576_vm1, %v668_v4 }
 0x19f   : > { %v714_v5 = vpop.permute.xlu0 %713  ;;  %v716_v6 = vpop.permute.xlu1 %715 }
 0x1a0   : > { %757 = vst.msk [vmem:[%s1438_s29 + $0x10] sm:$0xf] %vm576_vm1, %v714_v5  ;;  %758 = vst.msk [vmem:[%s1438_s29 + $0x14] sm:$0xf] %vm576_vm1, %v716_v6 }
 0x1a3   : > { %v730_v7 = vpop.permute.xlu0 %729  ;;  %v732_v8 = vpop.permute.xlu1 %731 }
 0x1a4   : > { %765 = vst.msk [vmem:[%s1438_s29 + $0x30] sm:$0xf] %vm576_vm1, %v730_v7  ;;  %766 = vst.msk [vmem:[%s1438_s29 + $0x34] sm:$0xf] %vm576_vm1, %v732_v8 }
 0x1a7   : > { %v734_v9 = vpop.permute.xlu0 %733  ;;  %v736_v10 = vpop.permute.xlu1 %735 }
 0x1a8   : > { %767 = vst.msk [vmem:[%s1438_s29 + $0x38] sm:$0xf] %vm576_vm1, %v734_v9  ;;  %768 = vst.msk [vmem:[%s1438_s29 + $0x3c] sm:$0xf] %vm576_vm1, %v736_v10 }
 0x1a9 PF: > { %s16_s22 = sadd.s32 1, %s1195_s22   ;;  %s1523_s18 = smov %s1187_s20 }
 0x1aa   : > { %p13_p7 = scmp.ge.s32.totalorder %s16_s22, 10   ;;  %s1524_s19 = smov %s1191_s21 }
 0x1ab   : > { %s1525_s20 = smov %s1528_s23  ;;  %s1526_s21 = smov %s1532_s24 }
 0x1ac   :  { %15 = sbr.rel (!%p13_p7) target bundleno = 3 (0x3), region = 92 }

</bundles_post_ra>
